<compile_context>
chip_gen: v7x
topology: tpu7x:2x2x1
jax: 0.10.0
libtpu: 0.0.40
codegen_flags: <defaults>
</compile_context>

<pallas_src>
import functools

import jax
import jax.numpy as jnp
from jax import lax
from jax.experimental import pallas as pl
from jax.experimental.pallas import tpu as pltpu


def _rmsle_partial_kernel(p_ref, a_ref, o_ref, *,
                          tile_rows, lanes, total_rows, tiles_per_split):
    s = pl.program_id(0)   # parallel split (megacore on v7x)
    t = pl.program_id(1)   # reduction over row-tiles within the split

    @pl.when(t == 0)
    def _():
        o_ref[...] = jnp.zeros_like(o_ref)

    # Logical tile index / global row offset for tail masking. Tiles whose
    # rows fall past `total_rows` (partial last tile, or overrun tiles when
    # num_splits doesn't divide the tile count) contribute exactly zero.
    tile_idx = s * tiles_per_split + t
    row0 = tile_idx * tile_rows
    ridx = row0 + lax.broadcasted_iota(jnp.int32, (tile_rows, lanes), 0)
    valid = ridx < total_rows

    p = p_ref[...].astype(jnp.float32)
    a = a_ref[...].astype(jnp.float32)
    d = jnp.where(valid, jnp.log1p(p) - jnp.log1p(a), 0.0)
    sq = d * d

    # Fold sublane groups into an (8, lanes) vector accumulator — VPU-only
    # adds in the hot loop; the single cross-lane reduce happens in the
    # wrapper on the tiny partial-sum output.
    partial = sq.reshape(tile_rows // 8, 8, lanes).sum(axis=0)
    o_ref[...] += partial.reshape(1, 8, lanes)


def rmsle_loss(pred, actual, *, tile_rows=2048, lanes=128, num_splits=2):
    assert pred.shape == actual.shape
    n = pred.size

    # Keep the original dtype — in-kernel cast avoids doubling HBM reads for
    # sub-32-bit inputs.
    p_flat = pred.reshape(-1)
    a_flat = actual.reshape(-1)

    # Minimal pad (< lanes elements) only so the flat array can be viewed as
    # (rows, lanes). Zero pads contribute 0 to the sum; divisor is the true n.
    pad = (-n) % lanes
    if pad:
        p_flat = jnp.concatenate([p_flat, jnp.zeros((pad,), p_flat.dtype)])
        a_flat = jnp.concatenate([a_flat, jnp.zeros((pad,), a_flat.dtype)])

    rows = p_flat.size // lanes
    P = p_flat.reshape(rows, lanes)
    A = a_flat.reshape(rows, lanes)

    # Clamp the tile to the problem size, keep it a multiple of 8 sublanes.
    tile_rows = max(8, ((tile_rows + 7) // 8) * 8)
    tile_rows = min(tile_rows, pl.cdiv(rows, 8) * 8)

    n_tiles = pl.cdiv(rows, tile_rows)
    num_splits = max(1, min(num_splits, n_tiles))
    tiles_per_split = pl.cdiv(n_tiles, num_splits)

    def in_map(s, t):
        # Clamp so overrun tiles (when num_splits doesn't divide n_tiles)
        # re-read the last valid tile; the kernel's row mask zeroes them out.
        return (jnp.minimum(s * tiles_per_split + t, n_tiles - 1), 0)

    partials = pl.pallas_call(
        functools.partial(
            _rmsle_partial_kernel,
            tile_rows=tile_rows, lanes=lanes,
            total_rows=rows, tiles_per_split=tiles_per_split),
        out_shape=jax.ShapeDtypeStruct((num_splits, 8, lanes), jnp.float32),
        grid_spec=pltpu.PrefetchScalarGridSpec(
            num_scalar_prefetch=0,
            grid=(num_splits, tiles_per_split),
            in_specs=[
                pl.BlockSpec((tile_rows, lanes), in_map),
                pl.BlockSpec((tile_rows, lanes), in_map),
            ],
            out_specs=pl.BlockSpec((1, 8, lanes), lambda s, t: (s, 0, 0)),
        ),
        compiler_params=pltpu.CompilerParams(
            # leading axis parallel (v7x megacore), reduction axis arbitrary
            dimension_semantics=("parallel", "arbitrary"),
        ),
    )(P, A)

    # Tiny final combine: sum of per-split (8, lanes) partials, then sqrt(mean).
    return jnp.sqrt(jnp.sum(partials) / n)


if __name__ == "__main__":
    key = jax.random.PRNGKey(0)
    kp, ka = jax.random.split(key)

    # NCHW, small shapes; non-negative values so log1p is well defined
    # (matches PyTorch RMSLELoss domain assumptions).
    pred = jax.random.uniform(kp, (2, 4, 16, 16), jnp.float32, minval=0.0, maxval=5.0)
    actual = jax.random.uniform(ka, (2, 4, 16, 16), jnp.float32, minval=0.0, maxval=5.0)

    loss = rmsle_loss(pred, actual)
    jax.block_until_ready(loss)

    # reference check in plain JAX
    ref = jnp.sqrt(jnp.mean((jnp.log1p(pred) - jnp.log1p(actual)) ** 2))
    assert jnp.allclose(loss, ref, rtol=1e-5, atol=1e-6), (loss, ref)

    print("KERNEL_OK")
</pallas_src>

<mosaic_0001>
module attributes {stable_mosaic.version = 11 : i64} {
  func.func @_rmsle_partial_kernel(%arg0: i32, %arg1: i32, %arg2: memref<16x128xf32, #tpu.memory_space<vmem>>, %arg3: memref<16x128xf32, #tpu.memory_space<vmem>>, %arg4: memref<1x8x128xf32, #tpu.memory_space<vmem>>) attributes {dimension_semantics = [#tpu.dimension_semantics<parallel>, #tpu.dimension_semantics<arbitrary>], iteration_bounds = array<i64: 1, 1>, scalar_prefetch = 0 : i64, scratch_operands = 0 : i64, tpu.core_type = #tpu.core_type<tc>, window_params = [{transform_indices = @transform_0, window_bounds = array<i64: 16, 128>}, {transform_indices = @transform_1, window_bounds = array<i64: 16, 128>}, {transform_indices = @transform_2, window_bounds = array<i64: 1, 8, 128>}]} {
    %c0_i32 = arith.constant 0 : i32
    %0 = arith.cmpi eq, %arg1, %c0_i32 : i32
    %1 = arith.extui %0 : i1 to i32
    %c0_i32_0 = arith.constant 0 : i32
    %2 = arith.cmpi ne, %1, %c0_i32_0 : i32
    scf.if %2 {
      %cst_12 = arith.constant 0.000000e+00 : f32
      %25 = vector.broadcast %cst_12 : f32 to vector<1x8x128xf32>
      %c0_13 = arith.constant 0 : index
      %c0_14 = arith.constant 0 : index
      %c0_15 = arith.constant 0 : index
      %26 = vector.load %arg4[%c0_13, %c0_14, %c0_15] : memref<1x8x128xf32, #tpu.memory_space<vmem>>, vector<1x8x128xf32>
      tpu.vector_store %arg4[%c0_13, %c0_14, %c0_15], %25 {strides = array<i32>} : memref<1x8x128xf32, #tpu.memory_space<vmem>>, vector<1x8x128xf32>,
    } else {
    }
    %c1_i32 = arith.constant 1 : i32
    %3 = arith.muli %arg0, %c1_i32 : i32
    %4 = arith.addi %3, %arg1 : i32
    %c16_i32 = arith.constant 16 : i32
    %5 = arith.muli %4, %c16_i32 : i32
    %6 = tpu.iota {dimensions = array<i32: 0>} : vector<16x128xi32>
    %7 = vector.broadcast %5 : i32 to vector<16x128xi32>
    %8 = arith.addi %7, %6 : vector<16x128xi32>
    %c16_i32_1 = arith.constant 16 : i32
    %9 = vector.broadcast %c16_i32_1 : i32 to vector<16x128xi32>
    %10 = arith.cmpi slt, %8, %9 : vector<16x128xi32>
    %c0 = arith.constant 0 : index
    %c0_2 = arith.constant 0 : index
    %11 = vector.load %arg2[%c0, %c0_2] : memref<16x128xf32, #tpu.memory_space<vmem>>, vector<16x128xf32>
    %c0_3 = arith.constant 0 : index
    %c0_4 = arith.constant 0 : index
    %12 = vector.load %arg3[%c0_3, %c0_4] : memref<16x128xf32, #tpu.memory_space<vmem>>, vector<16x128xf32>
    %13 = math.log1p %11 : vector<16x128xf32>
    %14 = math.log1p %12 : vector<16x128xf32>
    %15 = arith.subf %13, %14 : vector<16x128xf32>
    %cst = arith.constant 0.000000e+00 : f32
    %16 = vector.broadcast %cst : f32 to vector<16x128xf32>
    %17 = arith.select %10, %15, %16 : vector<16x128xi1>, vector<16x128xf32>
    %18 = arith.mulf %17, %17 : vector<16x128xf32>
    %19 = vector.shape_cast %18 : vector<16x128xf32> to vector<2x8x128xf32>
    %cst_5 = arith.constant dense<0.000000e+00> : vector<8x128xf32>
    %20 = vector.multi_reduction <add>, %19, %cst_5 [0] : vector<2x8x128xf32> to vector<8x128xf32>
    %c0_6 = arith.constant 0 : index
    %c0_7 = arith.constant 0 : index
    %c0_8 = arith.constant 0 : index
    %21 = vector.load %arg4[%c0_6, %c0_7, %c0_8] : memref<1x8x128xf32, #tpu.memory_space<vmem>>, vector<1x8x128xf32>
    %22 = vector.shape_cast %20 : vector<8x128xf32> to vector<1x8x128xf32>
    %23 = arith.addf %21, %22 : vector<1x8x128xf32>
    %c0_9 = arith.constant 0 : index
    %c0_10 = arith.constant 0 : index
    %c0_11 = arith.constant 0 : index
    %24 = vector.load %arg4[%c0_9, %c0_10, %c0_11] : memref<1x8x128xf32, #tpu.memory_space<vmem>>, vector<1x8x128xf32>
    tpu.vector_store %arg4[%c0_9, %c0_10, %c0_11], %23 {strides = array<i32>} : memref<1x8x128xf32, #tpu.memory_space<vmem>>, vector<1x8x128xf32>,
    return
  }
  func.func @transform_0(%arg0: i32, %arg1: i32) -> (i32, i32) {
    %c1_i32 = arith.constant 1 : i32
    %0 = arith.muli %arg0, %c1_i32 : i32
    %1 = arith.addi %0, %arg1 : i32
    %c0_i32 = arith.constant 0 : i32
    %2 = arith.minsi %1, %c0_i32 : i32
    %c0_i32_0 = arith.constant 0 : i32
    %c0_i32_1 = arith.constant 0 : i32
    return %2, %c0_i32_0 : i32, i32
  }
  func.func @transform_1(%arg0: i32, %arg1: i32) -> (i32, i32) {
    %c1_i32 = arith.constant 1 : i32
    %0 = arith.muli %arg0, %c1_i32 : i32
    %1 = arith.addi %0, %arg1 : i32
    %c0_i32 = arith.constant 0 : i32
    %2 = arith.minsi %1, %c0_i32 : i32
    %c0_i32_0 = arith.constant 0 : i32
    %c0_i32_1 = arith.constant 0 : i32
    return %2, %c0_i32_0 : i32, i32
  }
  func.func @transform_2(%arg0: i32, %arg1: i32) -> (i32, i32, i32) {
    %c0_i32 = arith.constant 0 : i32
    %c0_i32_0 = arith.constant 0 : i32
    %c0_i32_1 = arith.constant 0 : i32
    return %arg0, %c0_i32, %c0_i32_0 : i32, i32, i32
  }
}

</mosaic_0001>

<bundles_post_ra>
// kernel: tpu_custom_call.1
= control target key start
LH: loop header
LB: loop body
LE: loop exit
PB: predicated region body
PF: predicated region fallthrough
CT: control target
= control target key end

     0   :  { %7 = vsyncpa [#allocation3], 0  ;;  %s293_s0 = inlined_call_operand.hbm [shape: f32[16,128], index: 0, kind: input, shape index: {}]   ;;  %s294_s1 = inlined_call_operand.hbm [shape: f32[16,128], index: 1, kind: input, shape index: {}]   ;;  %s295_s2 = inlined_call_operand.hbm [shape: f32[1,8,128], index: 2, kind: output, shape index: {}]  }
   0x1   :  { %8 = vsyncpa [#allocation6], 0 }
   0x2   :  { %9 = vsyncpa [#allocation4], 0  ;;  %s231_s9 = smov [#allocation2]   ;;  %s159_s13 = scalar_lea.hbm %s293_s0, 256 }
   0x3   :  { %s21_s10 = sshll.u32 %s231_s9, 4  ;;  %p160_p0 = scmp.ne.s32.totalorder %s293_s0, %s159_s13  ;;  %s22_s10 = int_to_ptr.vmem [resolvable:$true] %s21_s10 }
   0x4   :  { %p163_p1 = scmp.lt.u32.totalorder %s159_s13, %s293_s0 }
   0x6   :  { %p165_p2 = pnand %p163_p1, %p160_p0 }
   0x8   :  { %168 = shalt.err (!%p165_p2)
}
   0x9   :  { %s169_s18 = scalar_lea.vmem %s22_s10, 256  ;;  %p174_p4 = scmp.lt.s32.totalorder %s22_s10, %s22_s10 }
   0xa   :  { %p170_p3 = scmp.ne.s32.totalorder %s22_s10, %s169_s18  ;;  %p175_p5 = scmp.lt.s32.totalorder %s169_s18, %s169_s18 }
   0xc   :  { %p176_p6 = por %p175_p5, %p174_p4 }
   0xe   :  { %p177_p7 = pnand %p176_p6, %p170_p3 }
  0x10   :  { %180 = shalt.err (!%p177_p7)
}
  0x11   :  { %s232_s19 = smov 128   ;;  %s233_s20 = smov 8  }
  0x12   :  { %27 = dma.hbm_to_vmem [thread:$0]  %s293_s0, 256, %s22_s10, [#allocation3], %s232_s19, %s232_s19, %s233_s20  }
  0x13   :  { %s234_s23 = smov [#allocation5]   ;;  %s181_s27 = scalar_lea.hbm %s294_s1, 256 }
  0x14   :  { %s39_s24 = sshll.u32 %s234_s23, 4  ;;  %p182_p8 = scmp.ne.s32.totalorder %s294_s1, %s181_s27  ;;  %s40_s24 = int_to_ptr.vmem [resolvable:$true] %s39_s24 }
  0x15   :  { %p185_p9 = scmp.lt.u32.totalorder %s181_s27, %s294_s1 }
  0x17   :  { %p187_p10 = pnand %p185_p9, %p182_p8 }
  0x19   :  { %190 = shalt.err (!%p187_p10)
}
  0x1a   :  { %s191_s4 = scalar_lea.vmem %s40_s24, 256  ;;  %p196_p12 = scmp.lt.s32.totalorder %s40_s24, %s40_s24 }
  0x1b   :  { %p192_p11 = scmp.ne.s32.totalorder %s40_s24, %s191_s4  ;;  %p197_p13 = scmp.lt.s32.totalorder %s191_s4, %s191_s4 }
  0x1d   :  { %p198_p0 = por %p197_p13, %p196_p12 }
  0x1f   :  { %p199_p1 = pnand %p198_p0, %p192_p11 }
  0x21   :  { %202 = shalt.err (!%p199_p1)
}
  0x22   :  { %45 = dma.hbm_to_vmem [thread:$0]  %s294_s1, 256, %s40_s24, [#allocation6], %s232_s19, %s232_s19, %s233_s20  }
  0x23   :  { %225 = dma.done.wait [#allocation3], 256  }
  0x24   :  { %226 = vsyncadd [#allocation3], 4294967040 }
  0x25   :  { %227 = dma.done.wait [#allocation6], 256  }
  0x26   :  { %228 = vsyncadd [#allocation6], 4294967040  ;;  %v75_v0 = vld [vmem:[#allocation2] sm:$0xff]  ;;  %v76_v1 = vld [vmem:[#allocation2 + $0x8] sm:$0xff]  ;;  %s235_s1 = smov [#allocation7]  }
  0x27   :  { %v77_v2 = vld [vmem:[#allocation5] sm:$0xff]  ;;  %v79_v3 = vadd.f32 1.0, %v75_v0  ;;  %v88_v4 = vadd.f32 1.0, %v76_v1  ;;  %v78_v5 = vld [vmem:[#allocation5 + $0x8] sm:$0xff]  ;;  %v82_v7 = vmul.f32 -0.5, %v75_v0  ;;  %v91_v9 = vmul.f32 -0.5, %v76_v1 }
  0x28   :  { %v97_v6 = vadd.f32 1.0, %v77_v2  ;;  %v106_v8 = vadd.f32 1.0, %v78_v5  ;;  %v100_v10 = vmul.f32 -0.5, %v77_v2  ;;  %v109_v12 = vmul.f32 -0.5, %v78_v5  ;;  %s131_s6 = sshll.u32 %s235_s1, 4  ;;  %s132_s6 = int_to_ptr.vmem [resolvable:$true] %s131_s6 }
  0x29   :  { %151 = vlog2.f32 %v79_v3  ;;  %v83_v11 = vadd.f32 1.0, %v82_v7  ;;  %v85_v13 = vand.u32 2147483647, %v75_v0  ;;  %v92_v14 = vadd.f32 1.0, %v91_v9  ;;  %s203_s7 = scalar_lea.vmem %s132_s6, 128  ;;  %p208_p3 = scmp.lt.s32.totalorder %s132_s6, %s132_s6 }
  0x2a   :  { %153 = vlog2.f32 %v88_v4  ;;  %v101_v15 = vadd.f32 1.0, %v100_v10  ;;  %v94_v16 = vand.u32 2147483647, %v76_v1  ;;  %v103_v17 = vand.u32 2147483647, %v77_v2  ;;  %p204_p2 = scmp.ne.s32.totalorder %s132_s6, %s203_s7  ;;  %p209_p4 = scmp.lt.s32.totalorder %s203_s7, %s203_s7 }
  0x2b   :  { %155 = vlog2.f32 %v97_v6  ;;  %v84_v18 = vmul.f32 %v83_v11, %v75_v0  ;;  %v110_v19 = vadd.f32 1.0, %v109_v12  ;;  %vm275_vm0 = vcmp.lt.f32.partialorder %v85_v13, 0.0004427343 }
  0x2c   :  { %157 = vlog2.f32 %v106_v8  ;;  %v112_v22 = vand.u32 2147483647, %v78_v5  ;;  %v93_v25 = vmul.f32 %v92_v14, %v76_v1  ;;  %v102_v26 = vmul.f32 %v101_v15, %v77_v2  ;;  %p210_p5 = por %p209_p4, %p208_p3 }
  0x2d   :  { %vm95_vm1 = vcmp.lt.f32.partialorder %v94_v16, 0.0004427343  ;;  %vm104_vm2 = vcmp.lt.f32.partialorder %v103_v17, 0.0004427343  ;;  %v111_v31 = vmul.f32 %v110_v19, %v78_v5 }
  0x2e   :  { %vm113_vm3 = vcmp.lt.f32.partialorder %v112_v22, 0.0004427343  ;;  %p211_p6 = pnand %p210_p5, %p204_p2 }
  0x33   :  { %v152_v20 = vpop.eup %151 }
  0x34   :  { %v154_v23 = vpop.eup %153  ;;  %v81_v24 = vmul.f32 0.6931472, %v152_v20 }
  0x35   :  { %v156_v27 = vpop.eup %155  ;;  %v90_v28 = vmul.f32 0.6931472, %v154_v23 }
  0x36   :  { %v87_v29 = vsel %vm275_vm0, %v84_v18, %v81_v24  ;;  %v99_v30 = vmul.f32 0.6931472, %v156_v27  ;;  %v158_v32 = vpop.eup %157 }
  0x37   :  { %v96_v33 = vsel %vm95_vm1, %v93_v25, %v90_v28  ;;  %v108_v35 = vmul.f32 0.6931472, %v158_v32 }
  0x38   :  { %v105_v34 = vsel %vm104_vm2, %v102_v26, %v99_v30 }
  0x39   :  { %v115_v36 = vsub.f32 %v87_v29, %v105_v34  ;;  %v114_v37 = vsel %vm113_vm3, %v111_v31, %v108_v35 }
  0x3a   :  { %v116_v38 = vsub.f32 %v96_v33, %v114_v37 }
  0x3b   :  { %v119_v39 = vmul.f32 %v115_v36, %v115_v36 }
  0x3c   :  { %v120_v40 = vmul.f32 %v116_v38, %v116_v38 }
  0x3e   :  { %v121_v41 = vadd.f32 %v120_v40, %v119_v39 }
  0x40   :  { %124 = vst [vmem:[#allocation7] sm:$0xff] %v121_v41 }
  0x41   :  { %214 = shalt.err (!%p211_p6)
}
  0x42   :  { %s215_s10 = scalar_lea.hbm %s295_s2, 128 }
  0x43   :  { %p216_p7 = scmp.ne.s32.totalorder %s295_s2, %s215_s10  ;;  %p219_p8 = scmp.lt.u32.totalorder %s215_s10, %s295_s2 }
  0x45   :  { %p221_p9 = pnand %p219_p8, %p216_p7 }
  0x47   :  { %224 = shalt.err (!%p221_p9)
}
  0x48   :  { %134 = dma.vmem_to_hbm [thread:$0]  %s132_s6, 128, %s295_s2, [#allocation4]  }
  0x49   :  { %229 = dma.done.wait [#allocation4], 128  }
  0x4a   :  { %230 = vsyncadd [#allocation4], 4294967168 }
  0x4b   :  { %138 = vsyncpa [#allocation3], 1 }
  0x4c   :  { %139 = vsyncpa [#allocation6], 1 }
  0x4d   :  { %140 = vsyncpa [#allocation4], 1 }

</bundles_post_ra>
